<compile_context>
chip_gen: v5e
topology: v5e:2x2
jax: 0.10.0
libtpu: 0.0.40
codegen_flags: <defaults>
</compile_context>

<pallas_src>
import jax
import jax.numpy as jnp
from jax.experimental import pallas as pl
from jax.experimental.pallas import tpu as pltpu

LANE = 128


# ---------------------------------------------------------------------------
# Phase 1 & 3 kernel: plain matmul + bias (lane-dense output).
# ---------------------------------------------------------------------------
def _matmul_bias_kernel(x_ref, w_ref, b_ref, o_ref):
    o_ref[...] = (jnp.dot(x_ref[...], w_ref[...],
                          preferred_element_type=jnp.float32)
                  + b_ref[...])


def _dense(x, w, b, *, row_tile=256):
    """y = x @ w + b via Pallas, tiled over rows. x:(M,K) w:(K,N) b:(1,N)."""
    M, K = x.shape
    N = w.shape[1]
    if M <= row_tile or M % row_tile != 0:
        row_tile = M                      # full block -> grid=(1,)
    # TODO(synk): at production vocab sizes also tile the N (vocab) axis so W_out
    # never has to sit fully resident in VMEM (matters on v7x's 64 MiB).
    return pl.pallas_call(
        _matmul_bias_kernel,
        out_shape=jax.ShapeDtypeStruct((M, N), jnp.float32),
        grid_spec=pltpu.PrefetchScalarGridSpec(
            num_scalar_prefetch=0,
            grid=(M // row_tile,),
            in_specs=[
                pl.BlockSpec((row_tile, K), lambda i: (i, 0)),
                pl.BlockSpec((K, N), lambda i: (0, 0)),
                pl.BlockSpec((1, N), lambda i: (0, 0)),
            ],
            out_specs=pl.BlockSpec((row_tile, N), lambda i: (i, 0)),
        ),
        compiler_params=pltpu.CompilerParams(
            dimension_semantics=("parallel",)),
    )(x, w, b)


# ---------------------------------------------------------------------------
# Phase 2 kernel: the serial 2-layer LSTM recurrence (chunk of Tc steps / grid step).
# ---------------------------------------------------------------------------
def _recurrence_kernel(xg_ref, whh1_ref, w2_ref, b2_ref, h2out_ref,
                       h1_s, c1_s, h2_s, c2_s):
    Hp = h1_s.shape[-1]
    Tc = xg_ref.shape[0]

    @pl.when(pl.program_id(0) == 0)
    def _():
        h1_s[...] = jnp.zeros_like(h1_s)
        c1_s[...] = jnp.zeros_like(c1_s)
        h2_s[...] = jnp.zeros_like(h2_s)
        c2_s[...] = jnp.zeros_like(c2_s)

    # Weights are block-constant: load once per grid step, reuse across the chunk.
    whh1 = whh1_ref[...]        # (Hp, 4Hp)
    w2 = w2_ref[...]            # (2Hp, 4Hp)  = [W_ih2^T ; W_hh2^T]
    b2 = b2_ref[...]            # (1, 4Hp)

    def lstm_gates(gates, c):
        # PyTorch gate order i, f, g, o; each slice is a full 128-lane group.
        i = jax.nn.sigmoid(gates[:, 0 * Hp:1 * Hp])
        f = jax.nn.sigmoid(gates[:, 1 * Hp:2 * Hp])
        g = jnp.tanh(gates[:, 2 * Hp:3 * Hp])
        o = jax.nn.sigmoid(gates[:, 3 * Hp:4 * Hp])
        c_new = f * c + i * g
        h_new = o * jnp.tanh(c_new)
        return h_new, c_new

    h1, c1 = h1_s[...], c1_s[...]
    h2, c2 = h2_s[...], c2_s[...]

    # Tc is small & static: fully unrolled serial recurrence.  Only h @ W_hh work
    # remains on the critical path (x @ W_ih1 + b1 was precomputed into xg).
    for t in range(Tc):
        gates1 = xg_ref[t] + jnp.dot(h1, whh1,
                                     preferred_element_type=jnp.float32)
        h1, c1 = lstm_gates(gates1, c1)
        gates2 = jnp.dot(jnp.concatenate([h1, h2], axis=-1), w2,
                         preferred_element_type=jnp.float32) + b2
        h2, c2 = lstm_gates(gates2, c2)
        h2out_ref[t] = h2

    h1_s[...] = h1
    c1_s[...] = c1
    h2_s[...] = h2
    c2_s[...] = c2


# ---------------------------------------------------------------------------
# Parameter preparation (padding / transposing / fusing) -- done once, outside.
# ---------------------------------------------------------------------------
def _round_up(n, m):
    return ((n + m - 1) // m) * m


def _pad_gate_cols(w, H, Hp):
    """(K, 4H) -> (K, 4Hp): each of the 4 gate blocks zero-padded H -> Hp."""
    K = w.shape[0]
    w4 = w.reshape(K, 4, H)
    out = jnp.zeros((K, 4, Hp), w.dtype).at[:, :, :H].set(w4)
    return out.reshape(K, 4 * Hp)


def _pad_rows(w, Hp):
    K = w.shape[0]
    return jnp.zeros((Hp,) + w.shape[1:], w.dtype).at[:K].set(w)


def prepare_kernel_params(params):
    """Build padded / fused kernel-side weights from logical (unpadded) params."""
    H = params["whh1_t"].shape[0]
    Vp1 = params["wout_t"].shape[1]
    Hp = _round_up(H, LANE)
    Vp = _round_up(Vp1, LANE)

    wih1 = _pad_gate_cols(params["wih1_t"], H, Hp)                    # (E, 4Hp)
    b1 = _pad_gate_cols(params["b1"], H, Hp)                          # (1, 4Hp)
    whh1 = _pad_rows(_pad_gate_cols(params["whh1_t"], H, Hp), Hp)     # (Hp, 4Hp)
    wih2 = _pad_rows(_pad_gate_cols(params["wih2_t"], H, Hp), Hp)     # (Hp, 4Hp)
    whh2 = _pad_rows(_pad_gate_cols(params["whh2_t"], H, Hp), Hp)     # (Hp, 4Hp)
    w2 = jnp.concatenate([wih2, whh2], axis=0)                        # (2Hp, 4Hp)
    b2 = _pad_gate_cols(params["b2"], H, Hp)                          # (1, 4Hp)
    wout = (jnp.zeros((Hp, Vp), jnp.float32)
            .at[:H, :Vp1].set(params["wout_t"]))                      # (Hp, Vp)
    bout = jnp.zeros((1, Vp), jnp.float32).at[:, :Vp1].set(params["bout"])

    return dict(embedding=params["embedding"],
                wih1_t=wih1, b1=b1, whh1_t=whh1,
                w2=w2, b2=b2, wout_t=wout, bout=bout)


def _pick_time_chunk(T, max_chunk=16):
    for c in range(min(T, max_chunk), 0, -1):
        if T % c == 0:
            return c
    return 1


# ---------------------------------------------------------------------------
# Forward wrapper.
# ---------------------------------------------------------------------------
def lstm_forward(batch_ids, kp, vocab_size):
    """batch_ids: int32 (B, T) token ids; returns logits (B, T, vocab_size+1)."""
    Vp1 = vocab_size + 1
    emb = kp["embedding"]
    x = jnp.take(emb, batch_ids, axis=0)             # (B, T, E) -- glue gather
    B, T, E = x.shape
    Hp = kp["whh1_t"].shape[0]
    Vp = kp["wout_t"].shape[1]

    x_tm = jnp.transpose(x, (1, 0, 2))               # (T, B, E) time-major

    # Phase 1: hoisted layer-1 input matmul + bias for all timesteps at once.
    xg = _dense(x_tm.reshape(T * B, E), kp["wih1_t"], kp["b1"])       # (T*B, 4Hp)
    xg = xg.reshape(T, B, 4 * Hp)

    # Phase 2: serial recurrence, chunked over time.
    Tc = _pick_time_chunk(T)
    h2_tm = pl.pallas_call(
        _recurrence_kernel,
        out_shape=jax.ShapeDtypeStruct((T, B, Hp), jnp.float32),
        grid_spec=pltpu.PrefetchScalarGridSpec(
            num_scalar_prefetch=0,
            grid=(T // Tc,),
            in_specs=[
                pl.BlockSpec((Tc, B, 4 * Hp), lambda t: (t, 0, 0)),   # xg chunk
                pl.BlockSpec((Hp, 4 * Hp), lambda t: (0, 0)),         # W_hh1^T
                pl.BlockSpec((2 * Hp, 4 * Hp), lambda t: (0, 0)),     # [W_ih2;W_hh2]^T
                pl.BlockSpec((1, 4 * Hp), lambda t: (0, 0)),          # b2
            ],
            out_specs=pl.BlockSpec((Tc, B, Hp), lambda t: (t, 0, 0)),
            scratch_shapes=[pltpu.VMEM((B, Hp), jnp.float32)] * 4,    # h1,c1,h2,c2
        ),
        compiler_params=pltpu.CompilerParams(
            dimension_semantics=("arbitrary",)),     # time axis carries state
    )(xg, kp["whh1_t"], kp["w2"], kp["b2"])

    # Phase 3: batched vocab projection over all timesteps (lane-dense, padded V).
    logits = _dense(h2_tm.reshape(T * B, Hp), kp["wout_t"], kp["bout"])  # (T*B, Vp)
    logits = logits.reshape(T, B, Vp)[:, :, :Vp1]
    return jnp.transpose(logits, (1, 0, 2))          # back to (B, T, V+1)


# ---------------------------------------------------------------------------
# Parameter init (PyTorch-equivalent logical params) + pure-JAX reference.
# ---------------------------------------------------------------------------
def init_params(key, vocab_size, embedding_dim, hidden_dim):
    V1 = vocab_size + 1
    E, H = embedding_dim, hidden_dim
    ks = jax.random.split(key, 12)
    u = lambda k, shape, s: jax.random.uniform(k, shape, jnp.float32, -s, s)
    s1 = 1.0 / (H ** 0.5)

    emb = jax.random.normal(ks[0], (V1, E), jnp.float32)
    emb = emb.at[0].set(0.0)                         # padding_idx=0

    # PyTorch nn.LSTM weights are (4H, in); store transposed for x @ W^T.
    wih1 = u(ks[1], (4 * H, E), s1)
    whh1 = u(ks[2], (4 * H, H), s1)
    bih1 = u(ks[3], (4 * H,), s1)
    bhh1 = u(ks[4], (4 * H,), s1)
    wih2 = u(ks[5], (4 * H, H), s1)
    whh2 = u(ks[6], (4 * H, H), s1)
    bih2 = u(ks[7], (4 * H,), s1)
    bhh2 = u(ks[8], (4 * H,), s1)
    wout = u(ks[9], (V1, H), s1)
    bout = u(ks[10], (V1,), s1)

    return dict(
        embedding=emb,
        wih1_t=wih1.T, whh1_t=whh1.T, b1=(bih1 + bhh1)[None, :],
        wih2_t=wih2.T, whh2_t=whh2.T, b2=(bih2 + bhh2)[None, :],
        wout_t=wout.T, bout=bout[None, :],
    )


def reference_forward(batch_ids, params):
    """Pure-JAX reference (lax.scan) for correctness check."""
    x = jnp.take(params["embedding"], batch_ids, axis=0)     # (B, T, E)
    H = params["whh1_t"].shape[0]
    B = x.shape[0]

    def cell(x_t, h, c, wih_t, whh_t, b):
        gates = x_t @ wih_t + h @ whh_t + b
        i = jax.nn.sigmoid(gates[:, 0 * H:1 * H])
        f = jax.nn.sigmoid(gates[:, 1 * H:2 * H])
        g = jnp.tanh(gates[:, 2 * H:3 * H])
        o = jax.nn.sigmoid(gates[:, 3 * H:4 * H])
        c_new = f * c + i * g
        return o * jnp.tanh(c_new), c_new

    def step(carry, x_t):
        h1, c1, h2, c2 = carry
        h1, c1 = cell(x_t, h1, c1, params["wih1_t"], params["whh1_t"], params["b1"])
        h2, c2 = cell(h1, h2, c2, params["wih2_t"], params["whh2_t"], params["b2"])
        return (h1, c1, h2, c2), h2 @ params["wout_t"] + params["bout"]

    z = jnp.zeros((B, H), jnp.float32)
    _, ys = jax.lax.scan(step, (z, z, z, z), jnp.transpose(x, (1, 0, 2)))
    return jnp.transpose(ys, (1, 0, 2))


if __name__ == "__main__":
    vocab_size = 32
    batch_size = 8
    embedding_dim = 32
    hidden_dim = 32
    seq_len = 8

    key = jax.random.PRNGKey(0)
    k_params, k_ids = jax.random.split(key)
    params = init_params(k_params, vocab_size, embedding_dim, hidden_dim)
    kparams = prepare_kernel_params(params)
    batch_ids = jax.random.randint(k_ids, (batch_size, seq_len), 0, vocab_size + 1,
                                   dtype=jnp.int32)

    logits = jax.block_until_ready(lstm_forward(batch_ids, kparams, vocab_size))
    assert logits.shape == (batch_size, seq_len, vocab_size + 1)

    ref = jax.block_until_ready(reference_forward(batch_ids, params))
    assert jnp.allclose(logits, ref, atol=1e-4, rtol=1e-4)

    print("KERNEL_OK")
</pallas_src>

<mosaic_0001>
module attributes {stable_mosaic.version = 11 : i64} {
  func.func @_matmul_bias_kernel(%arg0: i32, %arg1: memref<64x32xf32, #tpu.memory_space<vmem>>, %arg2: memref<32x512xf32, #tpu.memory_space<vmem>>, %arg3: memref<1x512xf32, #tpu.memory_space<vmem>>, %arg4: memref<64x512xf32, #tpu.memory_space<vmem>>) attributes {dimension_semantics = [#tpu.dimension_semantics<parallel>], iteration_bounds = array<i64: 1>, scalar_prefetch = 0 : i64, scratch_operands = 0 : i64, tpu.core_type = #tpu.core_type<tc>, window_params = [{transform_indices = @transform_0, window_bounds = array<i64: 64, 32>}, {pipeline_mode = #tpu.pipeline_mode<synchronous>, transform_indices = @transform_1, window_bounds = array<i64: 32, 512>}, {pipeline_mode = #tpu.pipeline_mode<synchronous>, transform_indices = @transform_2, window_bounds = array<i64: 1, 512>}, {transform_indices = @transform_3, window_bounds = array<i64: 64, 512>}]} {
    %c0 = arith.constant 0 : index
    %c0_0 = arith.constant 0 : index
    %0 = vector.load %arg1[%c0, %c0_0] : memref<64x32xf32, #tpu.memory_space<vmem>>, vector<64x32xf32>
    %c0_1 = arith.constant 0 : index
    %c0_2 = arith.constant 0 : index
    %1 = vector.load %arg2[%c0_1, %c0_2] : memref<32x512xf32, #tpu.memory_space<vmem>>, vector<32x512xf32>
    %cst = arith.constant dense<0.000000e+00> : vector<64x512xf32>
    %2 = tpu.matmul %0, %1, %cst {dimension_numbers = #tpu.dot_dimension_numbers<[1], [0], [0], [1], [0, 0, 1, 1], [], []>} : vector<64x32xf32>, vector<32x512xf32>, vector<64x512xf32> -> vector<64x512xf32>
    %c0_3 = arith.constant 0 : index
    %c0_4 = arith.constant 0 : index
    %3 = vector.load %arg3[%c0_3, %c0_4] : memref<1x512xf32, #tpu.memory_space<vmem>>, vector<1x512xf32>
    %4 = vector.broadcast %3 : vector<1x512xf32> to vector<64x512xf32>
    %5 = arith.addf %2, %4 : vector<64x512xf32>
    %c0_5 = arith.constant 0 : index
    %c0_6 = arith.constant 0 : index
    %6 = vector.load %arg4[%c0_5, %c0_6] : memref<64x512xf32, #tpu.memory_space<vmem>>, vector<64x512xf32>
    tpu.vector_store %arg4[%c0_5, %c0_6], %5 {strides = array<i32>} : memref<64x512xf32, #tpu.memory_space<vmem>>, vector<64x512xf32>,
    return
  }
  func.func @transform_0(%arg0: i32) -> (i32, i32) {
    %c0_i32 = arith.constant 0 : i32
    %c0_i32_0 = arith.constant 0 : i32
    return %arg0, %c0_i32 : i32, i32
  }
  func.func @transform_1(%arg0: i32) -> (i32, i32) {
    %c0_i32 = arith.constant 0 : i32
    %c0_i32_0 = arith.constant 0 : i32
    %c0_i32_1 = arith.constant 0 : i32
    return %c0_i32, %c0_i32_0 : i32, i32
  }
  func.func @transform_2(%arg0: i32) -> (i32, i32) {
    %c0_i32 = arith.constant 0 : i32
    %c0_i32_0 = arith.constant 0 : i32
    %c0_i32_1 = arith.constant 0 : i32
    return %c0_i32, %c0_i32_0 : i32, i32
  }
  func.func @transform_3(%arg0: i32) -> (i32, i32) {
    %c0_i32 = arith.constant 0 : i32
    %c0_i32_0 = arith.constant 0 : i32
    return %arg0, %c0_i32 : i32, i32
  }
}

</mosaic_0001>

<bundles_post_ra>
// kernel: tpu_custom_call.1
= control target key start
LH: loop header
LB: loop body
LE: loop exit
PB: predicated region body
PF: predicated region fallthrough
CT: control target
= control target key end

     0   :  { %8 = vsyncpa [#allocation3], 0  ;;  %s528_s0 = inlined_call_operand.vmem [shape: f32[64,32], index: 0, kind: input, shape index: {}]   ;;  %s529_s1 = inlined_call_operand.hbm [shape: f32[32,512], index: 1, kind: input, shape index: {}]   ;;  %s530_s2 = inlined_call_operand.vmem [shape: f32[1,512], index: 2, kind: input, shape index: {}]   ;;  %s531_s3 = inlined_call_operand.hbm [shape: f32[64,512], index: 3, kind: output, shape index: {}]  }
   0x1   :  { %9 = vsyncpa [#allocation4], 0  ;;  %s16_s14 = sshll.u32 %s529_s1, 4  ;;  %s393_s15 = smov [#allocation2]   ;;  %s17_s14 = int_to_ptr.hbm [resolvable:$true] %s16_s14 }
   0x2   :  { %s18_s16 = sshll.u32 %s393_s15, 4  ;;  %s394_s17 = smov 512   ;;  %s19_s16 = int_to_ptr.vmem [resolvable:$true] %s18_s16 }
   0x3   :  { %s395_s18 = smov 32  }
   0x4   :  { %24 = dma.hbm_to_vmem [thread:$0]  %s17_s14, 2048, %s19_s16, [#allocation3], %s394_s17, %s394_s17, %s395_s18  }
   0x5   :  { %389 = dma.done.wait [#allocation3], 2048  }
   0x6   :  { %390 = vsyncadd [#allocation3], 4294965248  ;;  %v53_v0 = vld [vmem:[#allocation2 + $0x70] sm:$0xff]  ;;  %v54_v1 = vld [vmem:[#allocation2 + $0x78] sm:$0xff]  ;;  %vm65_vm0 = vcmask 261120   ;;  %s292_s11 = sshll.u32 %s531_s3, 4  ;;  %s293_s11 = int_to_ptr.hbm [resolvable:$true] %s292_s11 }
   0x7   :  { %v49_v2 = vld [vmem:[#allocation2 + $0x50] sm:$0xff]  ;;  %184 = vmatpush.msra.mxu2 %v53_v0  ;;  %225 = vmatpush.msra.mxu3 %v54_v1  ;;  %v50_v3 = vld [vmem:[#allocation2 + $0x58] sm:$0xff]  ;;  %v51_v6 = vld [vmem:[#allocation2 + $0x60] sm:$0xff] }
   0x8   :  { %v45_v4 = vld [vmem:[#allocation2 + $0x30] sm:$0xff]  ;;  %v46_v5 = vld [vmem:[#allocation2 + $0x38] sm:$0xff]  ;;  %v52_v7 = vld [vmem:[#allocation2 + $0x68] sm:$0xff]  ;;  %102 = vmatpush.msra.mxu0 %v51_v6 }
   0x9   :  { %185 = vmatpush.msra.mxu2 %v49_v2  ;;  %226 = vmatpush.msra.mxu3 %v50_v3  ;;  %v47_v8 = vld [vmem:[#allocation2 + $0x40] sm:$0xff]  ;;  %v41_v9 = vld [vmem:[#allocation2 + $0x10] sm:$0xff]  ;;  %v42_v10 = vld [vmem:[#allocation2 + $0x18] sm:$0xff] }
   0xa   :  { %143 = vmatpush.msra.mxu1 %v52_v7  ;;  %v48_v11 = vld [vmem:[#allocation2 + $0x48] sm:$0xff]  ;;  %v31_v12 = vld [vmem:[%s528_s0] sm:$0xff]  ;;  %103 = vmatpush.msra.mxu0 %v47_v8  ;;  %v33_v18 = vld [vmem:[%s528_s0 + $0x10] sm:$0xff] }
   0xb   :  { %186 = vmatpush.msra.mxu2 %v45_v4  ;;  %227 = vmatpush.msra.mxu3 %v46_v5  ;;  %v43_v13 = vld [vmem:[#allocation2 + $0x20] sm:$0xff]  ;;  %v44_v14 = vld [vmem:[#allocation2 + $0x28] sm:$0xff]  ;;  %v34_v19 = vld [vmem:[%s528_s0 + $0x18] sm:$0xff] }
   0xc   :  { %144 = vmatpush.msra.mxu1 %v48_v11  ;;  %v39_v15 = vld [vmem:[#allocation2] sm:$0xff]  ;;  %v40_v16 = vld [vmem:[#allocation2 + $0x8] sm:$0xff]  ;;  %104 = vmatpush.msra.mxu0 %v43_v13  ;;  %v37_v22 = vld [vmem:[%s528_s0 + $0x30] sm:$0xff] }
   0xd   :  { %187 = vmatpush.msra.mxu2 %v41_v9  ;;  %228 = vmatpush.msra.mxu3 %v42_v10  ;;  %v32_v17 = vld [vmem:[%s528_s0 + $0x8] sm:$0xff]  ;;  %v35_v20 = vld [vmem:[%s528_s0 + $0x20] sm:$0xff]  ;;  %v38_v23 = vld [vmem:[%s528_s0 + $0x38] sm:$0xff] }
   0xe   :  { %321 = vmatmul.msk.f32.vlgmr.msra.gmra.mxu2 %vm65_vm0, %v31_v12  ;;  %329 = vmatmul.msk.f32.vlgmr.msra.gmra.mxu3 %vm65_vm0, %v31_v12  ;;  %v36_v21 = vld [vmem:[%s528_s0 + $0x28] sm:$0xff]  ;;  %v55_v24 = vld [vmem:[%s530_s2] sm:$0xf]  ;;  %s396_s0 = smov [#allocation5]  }
   0xf   :  { %145 = vmatpush.msra.mxu1 %v44_v14  ;;  %105 = vmatpush.msra.mxu0 %v39_v15  ;;  %v482_v25 = vperm.slane %v55_v24, 0  ;;  %v484_v26 = vperm.slane %v55_v24, 1  ;;  %v486_v27 = vperm.slane %v55_v24, 2  ;;  %v488_v28 = vperm.slane %v55_v24, 3  ;;  %s290_s2 = sshll.u32 %s396_s0, 4  ;;  %s291_s2 = int_to_ptr.vmem [resolvable:$true] %s290_s2 }
  0x10   :  { %305 = vmatmul.msk.f32.vlgmr.msra.gmra.mxu0 %vm65_vm0, %v31_v12 }
  0x11   :  { %146 = vmatpush.msra.mxu1 %v40_v16 }
  0x12   :  { %313 = vmatmul.msk.f32.vlgmr.msra.gmra.mxu1 %vm65_vm0, %v31_v12 }
  0x16   :  { %322 = vmatmul.msk.f32.gmra.mxu2 %vm65_vm0, %v32_v17  ;;  %330 = vmatmul.msk.f32.gmra.mxu3 %vm65_vm0, %v32_v17 }
  0x18   :  { %306 = vmatmul.msk.f32.gmra.mxu0 %vm65_vm0, %v32_v17 }
  0x1a   :  { %314 = vmatmul.msk.f32.gmra.mxu1 %vm65_vm0, %v32_v17 }
  0x1e   :  { %323 = vmatmul.msk.f32.gmra.mxu2 %vm65_vm0, %v33_v18  ;;  %331 = vmatmul.msk.f32.gmra.mxu3 %vm65_vm0, %v33_v18 }
  0x20   :  { %307 = vmatmul.msk.f32.gmra.mxu0 %vm65_vm0, %v33_v18 }
  0x22   :  { %315 = vmatmul.msk.f32.gmra.mxu1 %vm65_vm0, %v33_v18 }
  0x26   :  { %324 = vmatmul.msk.f32.gmra.mxu2 %vm65_vm0, %v34_v19  ;;  %332 = vmatmul.msk.f32.gmra.mxu3 %vm65_vm0, %v34_v19 }
  0x28   :  { %308 = vmatmul.msk.f32.gmra.mxu0 %vm65_vm0, %v34_v19 }
  0x2a   :  { %316 = vmatmul.msk.f32.gmra.mxu1 %vm65_vm0, %v34_v19 }
  0x2e   :  { %325 = vmatmul.msk.f32.gmra.mxu2 %vm65_vm0, %v35_v20  ;;  %333 = vmatmul.msk.f32.gmra.mxu3 %vm65_vm0, %v35_v20 }
  0x30   :  { %309 = vmatmul.msk.f32.gmra.mxu0 %vm65_vm0, %v35_v20 }
  0x32   :  { %317 = vmatmul.msk.f32.gmra.mxu1 %vm65_vm0, %v35_v20 }
  0x36   :  { %326 = vmatmul.msk.f32.gmra.mxu2 %vm65_vm0, %v36_v21  ;;  %334 = vmatmul.msk.f32.gmra.mxu3 %vm65_vm0, %v36_v21 }
  0x38   :  { %310 = vmatmul.msk.f32.gmra.mxu0 %vm65_vm0, %v36_v21 }
  0x3a   :  { %318 = vmatmul.msk.f32.gmra.mxu1 %vm65_vm0, %v36_v21 }
  0x3e   :  { %327 = vmatmul.msk.f32.gmra.mxu2 %vm65_vm0, %v37_v22  ;;  %335 = vmatmul.msk.f32.gmra.mxu3 %vm65_vm0, %v37_v22 }
  0x40   :  { %311 = vmatmul.msk.f32.gmra.mxu0 %vm65_vm0, %v37_v22 }
  0x42   :  { %319 = vmatmul.msk.f32.gmra.mxu1 %vm65_vm0, %v37_v22 }
  0x46   :  { %328 = vmatmul.msk.f32.gmra.mxu2 %vm65_vm0, %v38_v23  ;;  %336 = vmatmul.msk.f32.gmra.mxu3 %vm65_vm0, %v38_v23 }
  0x48   :  { %312 = vmatmul.msk.f32.gmra.mxu0 %vm65_vm0, %v38_v23 }
  0x4a   :  { %320 = vmatmul.msk.f32.gmra.mxu1 %vm65_vm0, %v38_v23 }
  0x8d   :  { %v107_v29 = vpop.f32.mrf.mxu0 }
  0x8e   :  { %v108_v31 = vadd.f32 %v107_v29, %v482_v25 }
  0x8f   :  { %v148_v30 = vpop.f32.mrf.mxu1 }
  0x90   :  { %v149_v32 = vadd.f32 %v148_v30, %v484_v26  ;;  %254 = vst [vmem:[#allocation5] sm:$0xff] %v108_v31 }
  0x91   :  { %v189_v33 = vpop.f32.mrf.mxu2  ;;  %v230_v34 = vpop.f32.mrf.mxu3 }
  0x92   :  { %v190_v35 = vadd.f32 %v189_v33, %v486_v27  ;;  %v231_v36 = vadd.f32 %v230_v34, %v488_v28  ;;  %255 = vst [vmem:[#allocation5 + $0x8] sm:$0xff] %v149_v32 }
  0x94   :  { %256 = vst [vmem:[#allocation5 + $0x10] sm:$0xff] %v190_v35 }
  0x95   :  { %257 = vst [vmem:[#allocation5 + $0x18] sm:$0xff] %v231_v36  ;;  %v110_v37 = vpop.f32.mrf.mxu0 }
  0x96   :  { %v111_v39 = vadd.f32 %v110_v37, %v482_v25 }
  0x97   :  { %v151_v38 = vpop.f32.mrf.mxu1 }
  0x98   :  { %v152_v40 = vadd.f32 %v151_v38, %v484_v26  ;;  %258 = vst [vmem:[#allocation5 + $0x20] sm:$0xff] %v111_v39 }
  0x99   :  { %v192_v41 = vpop.f32.mrf.mxu2  ;;  %v233_v42 = vpop.f32.mrf.mxu3 }
  0x9a   :  { %v193_v43 = vadd.f32 %v192_v41, %v486_v27  ;;  %v234_v44 = vadd.f32 %v233_v42, %v488_v28  ;;  %259 = vst [vmem:[#allocation5 + $0x28] sm:$0xff] %v152_v40 }
  0x9c   :  { %260 = vst [vmem:[#allocation5 + $0x30] sm:$0xff] %v193_v43 }
  0x9d   :  { %261 = vst [vmem:[#allocation5 + $0x38] sm:$0xff] %v234_v44  ;;  %v113_v45 = vpop.f32.mrf.mxu0 }
  0x9e   :  { %v114_v47 = vadd.f32 %v113_v45, %v482_v25 }
  0x9f   :  { %v154_v46 = vpop.f32.mrf.mxu1 }
  0xa0   :  { %v155_v48 = vadd.f32 %v154_v46, %v484_v26  ;;  %262 = vst [vmem:[#allocation5 + $0x40] sm:$0xff] %v114_v47 }
  0xa1   :  { %v195_v49 = vpop.f32.mrf.mxu2  ;;  %v236_v50 = vpop.f32.mrf.mxu3 }
  0xa2   :  { %v196_v51 = vadd.f32 %v195_v49, %v486_v27  ;;  %v237_v52 = vadd.f32 %v236_v50, %v488_v28  ;;  %263 = vst [vmem:[#allocation5 + $0x48] sm:$0xff] %v155_v48 }
  0xa4   :  { %264 = vst [vmem:[#allocation5 + $0x50] sm:$0xff] %v196_v51 }
  0xa5   :  { %265 = vst [vmem:[#allocation5 + $0x58] sm:$0xff] %v237_v52  ;;  %v116_v53 = vpop.f32.mrf.mxu0 }
  0xa6   :  { %v117_v55 = vadd.f32 %v116_v53, %v482_v25 }
  0xa7   :  { %v157_v54 = vpop.f32.mrf.mxu1 }
  0xa8   :  { %v158_v56 = vadd.f32 %v157_v54, %v484_v26  ;;  %266 = vst [vmem:[#allocation5 + $0x60] sm:$0xff] %v117_v55 }
  0xa9   :  { %v198_v57 = vpop.f32.mrf.mxu2  ;;  %v239_v58 = vpop.f32.mrf.mxu3 }
  0xaa   :  { %v199_v59 = vadd.f32 %v198_v57, %v486_v27  ;;  %v240_v60 = vadd.f32 %v239_v58, %v488_v28  ;;  %267 = vst [vmem:[#allocation5 + $0x68] sm:$0xff] %v158_v56 }
  0xac   :  { %268 = vst [vmem:[#allocation5 + $0x70] sm:$0xff] %v199_v59 }
  0xad   :  { %269 = vst [vmem:[#allocation5 + $0x78] sm:$0xff] %v240_v60  ;;  %v119_v61 = vpop.f32.mrf.mxu0 }
  0xae   :  { %v120_v63 = vadd.f32 %v119_v61, %v482_v25 }
  0xaf   :  { %v160_v62 = vpop.f32.mrf.mxu1 }
  0xb0   :  { %v161_v0 = vadd.f32 %v160_v62, %v484_v26  ;;  %270 = vst [vmem:[#allocation5 + $0x80] sm:$0xff] %v120_v63 }
  0xb1   :  { %v201_v1 = vpop.f32.mrf.mxu2  ;;  %v242_v2 = vpop.f32.mrf.mxu3 }
  0xb2   :  { %v202_v3 = vadd.f32 %v201_v1, %v486_v27  ;;  %v243_v4 = vadd.f32 %v242_v2, %v488_v28  ;;  %271 = vst [vmem:[#allocation5 + $0x88] sm:$0xff] %v161_v0 }
  0xb4   :  { %272 = vst [vmem:[#allocation5 + $0x90] sm:$0xff] %v202_v3 }
  0xb5   :  { %273 = vst [vmem:[#allocation5 + $0x98] sm:$0xff] %v243_v4  ;;  %v122_v5 = vpop.f32.mrf.mxu0 }
  0xb6   :  { %v123_v7 = vadd.f32 %v122_v5, %v482_v25 }
  0xb7   :  { %v163_v6 = vpop.f32.mrf.mxu1 }
  0xb8   :  { %v164_v8 = vadd.f32 %v163_v6, %v484_v26  ;;  %274 = vst [vmem:[#allocation5 + $0xa0] sm:$0xff] %v123_v7 }
  0xb9   :  { %v204_v9 = vpop.f32.mrf.mxu2  ;;  %v245_v10 = vpop.f32.mrf.mxu3 }
  0xba   :  { %v205_v11 = vadd.f32 %v204_v9, %v486_v27  ;;  %v246_v12 = vadd.f32 %v245_v10, %v488_v28  ;;  %275 = vst [vmem:[#allocation5 + $0xa8] sm:$0xff] %v164_v8 }
  0xbc   :  { %276 = vst [vmem:[#allocation5 + $0xb0] sm:$0xff] %v205_v11 }
  0xbd   :  { %277 = vst [vmem:[#allocation5 + $0xb8] sm:$0xff] %v246_v12  ;;  %v125_v13 = vpop.f32.mrf.mxu0 }
  0xbe   :  { %v126_v15 = vadd.f32 %v125_v13, %v482_v25 }
  0xbf   :  { %v166_v14 = vpop.f32.mrf.mxu1 }
  0xc0   :  { %v167_v16 = vadd.f32 %v166_v14, %v484_v26  ;;  %278 = vst [vmem:[#allocation5 + $0xc0] sm:$0xff] %v126_v15 }
  0xc1   :  { %v207_v17 = vpop.f32.mrf.mxu2  ;;  %v248_v18 = vpop.f32.mrf.mxu3 }
  0xc2   :  { %v208_v19 = vadd.f32 %v207_v17, %v486_v27  ;;  %v249_v20 = vadd.f32 %v248_v18, %v488_v28  ;;  %279 = vst [vmem:[#allocation5 + $0xc8] sm:$0xff] %v167_v16 }
  0xc4   :  { %280 = vst [vmem:[#allocation5 + $0xd0] sm:$0xff] %v208_v19 }
  0xc5   :  { %281 = vst [vmem:[#allocation5 + $0xd8] sm:$0xff] %v249_v20  ;;  %v128_v21 = vpop.f32.mrf.mxu0 }
  0xc6   :  { %v129_v23 = vadd.f32 %v128_v21, %v482_v25 }
  0xc7   :  { %v169_v22 = vpop.f32.mrf.mxu1 }
  0xc8   :  { %v170_v24 = vadd.f32 %v169_v22, %v484_v26  ;;  %282 = vst [vmem:[#allocation5 + $0xe0] sm:$0xff] %v129_v23 }
  0xc9   :  { %v210_v29 = vpop.f32.mrf.mxu2  ;;  %v251_v30 = vpop.f32.mrf.mxu3 }
  0xca   :  { %v211_v31 = vadd.f32 %v210_v29, %v486_v27  ;;  %v252_v32 = vadd.f32 %v251_v30, %v488_v28  ;;  %283 = vst [vmem:[#allocation5 + $0xe8] sm:$0xff] %v170_v24 }
  0xcc   :  { %284 = vst [vmem:[#allocation5 + $0xf0] sm:$0xff] %v211_v31 }
  0xcd   :  { %285 = vst [vmem:[#allocation5 + $0xf8] sm:$0xff] %v252_v32 }
  0xce   :  { %298 = dma.vmem_to_hbm [thread:$0]  %s291_s2, 4096, %s293_s11, [#allocation4], %s394_s17, %s394_s17, %s395_s18  }
  0xcf   :  { %391 = dma.done.wait [#allocation4], 4096  }
  0xd0   :  { %392 = vsyncadd [#allocation4], 4294963200 }
  0xd1   :  { %303 = vsyncpa [#allocation3], 1 }
  0xd2   :  { %304 = vsyncpa [#allocation4], 1 }

</bundles_post_ra>
